<compile_context>
chip_gen: v7x
topology: tpu7x:2x2x1
jax: 0.10.0
libtpu: 0.0.40
codegen_flags: <defaults>
</compile_context>

<pallas_src>
import math
from functools import partial

import jax
import jax.numpy as jnp
from jax import lax
from jax.experimental import pallas as pl
from jax.experimental.pallas import tpu as pltpu

EPS = 1e-5  # nn.InstanceNorm2d default eps


def _build_big_weight(w_oihw, W):
    """(Cout, Cin, 3, 3) OIHW -> (3*(W+2)*Cin, W*Cout) block-sparse matrix.

    With the padded, lane-dense image P[y, (dy*(W+2)+xw)*Cin + c] (three
    vertically shifted rows concatenated along lanes), the whole 3x3 conv is a
    single matmul  out2d = P @ BigW  with
        BigW[(dy*(W+2)+xw)*Cin + c, x*Cout + o] = w[o, c, dy, xw-x]  (0<=xw-x<3)
    """
    Cout, Cin, KH, KW = w_oihw.shape
    w_t = jnp.transpose(w_oihw, (2, 3, 1, 0))          # (dy, dx, Cin, Cout)
    xw = jnp.arange(W + 2)[:, None]                    # padded column index
    xo = jnp.arange(W)[None, :]                        # output column index
    d = xw - xo                                        # implied dx, (W+2, W)
    valid = ((d >= 0) & (d < KW)).astype(w_t.dtype)
    dc = jnp.clip(d, 0, KW - 1)
    g = w_t[:, dc] * valid[None, :, :, None, None]     # (3, W+2, W, Cin, Cout)
    g = jnp.transpose(g, (0, 1, 3, 2, 4))              # (3, W+2, Cin, W, Cout)
    return g.reshape(KH * (W + 2) * Cin, W * Cout)


def basic_block_kernel(x_ref, w1_ref, w2_ref, o_ref, *, C, W, H):
    """One image per grid step.

    x_ref:  (1, H, W*C)            lane-dense image (compute dtype, e.g. bf16)
    w1_ref: (3*(W+2)*C, W*C)       conv1 block-sparse weight matrix
    w2_ref: (3*(W+2)*C, W*C)       conv2 block-sparse weight matrix
    o_ref:  (1, H, W*C)            f32 output
    """
    L = W * C
    inv_hw = 1.0 / (H * W)

    # channel <-> lane selector matrices (lane j carries channel j % C).
    jr = lax.broadcasted_iota(jnp.int32, (L, C), 0)
    cr = lax.broadcasted_iota(jnp.int32, (L, C), 1)
    sel_reduce = (jr % C == cr).astype(jnp.float32)        # (L, C)
    cb = lax.broadcasted_iota(jnp.int32, (C, L), 0)
    jb = lax.broadcasted_iota(jnp.int32, (C, L), 1)
    sel_bcast = (jb % C == cb).astype(jnp.float32)         # (C, L)

    def conv3x3(a_f32, w_ref):
        # zero-pad in-register (lanes then sublanes), then one MXU matmul.
        zc = jnp.zeros((H, C), jnp.float32)
        ap = jnp.concatenate([zc, a_f32, zc], axis=1)             # (H, (W+2)*C)
        zr = jnp.zeros((1, (W + 2) * C), jnp.float32)
        ap = jnp.concatenate([zr, ap, zr], axis=0)                # (H+2, (W+2)*C)
        p = jnp.concatenate([ap[0:H], ap[1:H + 1], ap[2:H + 2]],
                            axis=1)                               # (H, 3*(W+2)*C)
        return jnp.dot(p.astype(w_ref.dtype), w_ref[...],
                       preferred_element_type=jnp.float32)        # (H, W*C) f32

    def instance_norm(acc):
        # One-pass biased variance per channel (channels live in lanes mod C).
        s1 = jnp.sum(acc, axis=0, keepdims=True)                  # (1, L)
        s2 = jnp.sum(acc * acc, axis=0, keepdims=True)            # (1, L)
        mean_c = jnp.dot(s1, sel_reduce) * inv_hw                 # (1, C)
        ex2_c = jnp.dot(s2, sel_reduce) * inv_hw                  # (1, C)
        var_c = jnp.maximum(ex2_c - mean_c * mean_c, 0.0)
        rstd_c = lax.rsqrt(var_c + EPS)
        mean_l = jnp.dot(mean_c, sel_bcast)                       # (1, L)
        rstd_l = jnp.dot(rstd_c, sel_bcast)                       # (1, L)
        return (acc - mean_l) * rstd_l

    x_f32 = x_ref[0].astype(jnp.float32)                          # (H, W*C)

    acc1 = conv3x3(x_f32, w1_ref)
    # TODO(synk): F.dropout(p=0.2) is a no-op in eval mode (implemented here);
    # training-mode stochastic dropout would use pltpu.prng_seed/prng_random_bits.
    h = jnp.maximum(instance_norm(acc1), 0.0)

    acc2 = conv3x3(h, w2_ref)
    out = instance_norm(acc2) + x_f32                             # residual
    o_ref[0] = jnp.maximum(out, 0.0)


def basic_block(x_nchw, w1_oihw, w2_oihw, *, compute_dtype=jnp.bfloat16):
    """x: (N, C, H, W) f32; weights in PyTorch OIHW (C, C, 3, 3)."""
    N, C, H, W = x_nchw.shape
    assert w1_oihw.shape == (C, C, 3, 3) and w2_oihw.shape == (C, C, 3, 3)

    # NCHW -> lane-dense (N, H, W*C); channels packed into the lane dimension.
    x2d = (jnp.transpose(x_nchw, (0, 2, 3, 1))
           .reshape(N, H, W * C).astype(compute_dtype))

    w1b = _build_big_weight(w1_oihw, W).astype(compute_dtype)     # (3*(W+2)*C, W*C)
    w2b = _build_big_weight(w2_oihw, W).astype(compute_dtype)
    KWC = 3 * (W + 2) * C

    out2d = pl.pallas_call(
        partial(basic_block_kernel, C=C, W=W, H=H),
        out_shape=jax.ShapeDtypeStruct((N, H, W * C), jnp.float32),
        grid_spec=pltpu.PrefetchScalarGridSpec(
            num_scalar_prefetch=0,
            grid=(N,),
            in_specs=[
                pl.BlockSpec((1, H, W * C), lambda n: (n, 0, 0)),
                pl.BlockSpec((KWC, W * C), lambda n: (0, 0)),
                pl.BlockSpec((KWC, W * C), lambda n: (0, 0)),
            ],
            out_specs=pl.BlockSpec((1, H, W * C), lambda n: (n, 0, 0)),
        ),
        compiler_params=pltpu.CompilerParams(
            dimension_semantics=("parallel",)),
    )(x2d, w1b, w2b)

    out = out2d.reshape(N, H, W, C)
    return jnp.transpose(out, (0, 3, 1, 2))


def reference(x, w1, w2):
    """Pure-JAX NCHW reference of BasicBlock.forward (eval-mode dropout)."""
    def conv(z, w):
        return lax.conv_general_dilated(
            z, w, window_strides=(1, 1), padding=((1, 1), (1, 1)),
            dimension_numbers=("NCHW", "OIHW", "NCHW"))

    def inorm(z):
        m = jnp.mean(z, axis=(2, 3), keepdims=True)
        v = jnp.mean((z - m) ** 2, axis=(2, 3), keepdims=True)
        return (z - m) * lax.rsqrt(v + EPS)

    h = jnp.maximum(inorm(conv(x, w1)), 0.0)
    o = inorm(conv(h, w2)) + x
    return jnp.maximum(o, 0.0)


if __name__ == "__main__":
    key = jax.random.PRNGKey(0)
    kx, kw1, kw2 = jax.random.split(key, 3)

    N, C, H, W = 2, 4, 16, 16            # inplanes == planes == 4
    x = jax.random.normal(kx, (N, C, H, W), jnp.float32)

    fan_in = C * 3 * 3                   # deterministic kaiming-like scale
    w1 = jax.random.normal(kw1, (C, C, 3, 3), jnp.float32) / math.sqrt(fan_in)
    w2 = jax.random.normal(kw2, (C, C, 3, 3), jnp.float32) / math.sqrt(fan_in)

    out = jax.block_until_ready(basic_block(x, w1, w2))

    # Reference computed in f32 on the bf16-rounded operands the kernel consumes
    # (the kernel accumulates in f32; remaining diff is the bf16 intermediate).
    q = lambda a: a.astype(jnp.bfloat16).astype(jnp.float32)
    ref = reference(q(x), q(w1), q(w2))

    assert out.shape == (N, C, H, W)
    max_err = float(jnp.max(jnp.abs(out - ref)))
    assert jnp.allclose(out, ref, atol=3e-2, rtol=3e-2), max_err

    print("KERNEL_OK")
</pallas_src>

<mosaic_0001>
module attributes {stable_mosaic.version = 11 : i64} {
  func.func @basic_block_kernel(%arg0: i32, %arg1: memref<1x16x64xbf16, #tpu.memory_space<vmem>>, %arg2: memref<216x64xbf16, #tpu.memory_space<vmem>>, %arg3: memref<216x64xbf16, #tpu.memory_space<vmem>>, %arg4: memref<1x16x64xf32, #tpu.memory_space<vmem>>) attributes {dimension_semantics = [#tpu.dimension_semantics<parallel>], iteration_bounds = array<i64: 2>, scalar_prefetch = 0 : i64, scratch_operands = 0 : i64, tpu.core_type = #tpu.core_type<tc>, window_params = [{transform_indices = @transform_0, window_bounds = array<i64: 1, 16, 64>}, {pipeline_mode = #tpu.pipeline_mode<synchronous>, transform_indices = @transform_1, window_bounds = array<i64: 216, 64>}, {pipeline_mode = #tpu.pipeline_mode<synchronous>, transform_indices = @transform_2, window_bounds = array<i64: 216, 64>}, {transform_indices = @transform_3, window_bounds = array<i64: 1, 16, 64>}]} {
    %0 = tpu.iota {dimensions = array<i32: 0>} : vector<64x4xi32>
    %1 = tpu.iota {dimensions = array<i32: 1>} : vector<64x4xi32>
    %c4_i32 = arith.constant 4 : i32
    %c0_i32 = arith.constant 0 : i32
    %2 = arith.cmpi eq, %c4_i32, %c0_i32 : i32
    %c1_i32 = arith.constant 1 : i32
    %3 = arith.select %2, %c1_i32, %c4_i32 : i32
    %4 = vector.broadcast %3 : i32 to vector<64x4xi32>
    %5 = arith.remsi %0, %4 : vector<64x4xi32>
    %c0_i32_0 = arith.constant 0 : i32
    %6 = vector.broadcast %c0_i32_0 : i32 to vector<64x4xi32>
    %7 = arith.cmpi ne, %5, %6 : vector<64x4xi32>
    %c0_i32_1 = arith.constant 0 : i32
    %8 = vector.broadcast %c0_i32_1 : i32 to vector<64x4xi32>
    %9 = arith.cmpi slt, %5, %8 : vector<64x4xi32>
    %c0_i32_2 = arith.constant 0 : i32
    %10 = arith.cmpi slt, %3, %c0_i32_2 : i32
    %11 = vector.broadcast %10 : i1 to vector<64x4xi1>
    %12 = vector.broadcast %11 : vector<64x4xi1> to vector<64x4xi1>
    %13 = arith.xori %9, %12 : vector<64x4xi1>
    %14 = arith.andi %13, %7 : vector<64x4xi1>
    %15 = vector.broadcast %3 : i32 to vector<64x4xi32>
    %16 = arith.addi %5, %15 : vector<64x4xi32>
    %17 = arith.select %14, %16, %5 : vector<64x4xi1>, vector<64x4xi32>
    %18 = arith.cmpi eq, %17, %1 : vector<64x4xi32>
    %19 = arith.extui %18 : vector<64x4xi1> to vector<64x4xi32>
    %20 = arith.sitofp %19 : vector<64x4xi32> to vector<64x4xf32>
    %21 = tpu.iota {dimensions = array<i32: 0>} : vector<4x64xi32>
    %22 = tpu.iota {dimensions = array<i32: 1>} : vector<4x64xi32>
    %c4_i32_3 = arith.constant 4 : i32
    %c0_i32_4 = arith.constant 0 : i32
    %23 = arith.cmpi eq, %c4_i32_3, %c0_i32_4 : i32
    %c1_i32_5 = arith.constant 1 : i32
    %24 = arith.select %23, %c1_i32_5, %c4_i32_3 : i32
    %25 = vector.broadcast %24 : i32 to vector<4x64xi32>
    %26 = arith.remsi %22, %25 : vector<4x64xi32>
    %c0_i32_6 = arith.constant 0 : i32
    %27 = vector.broadcast %c0_i32_6 : i32 to vector<4x64xi32>
    %28 = arith.cmpi ne, %26, %27 : vector<4x64xi32>
    %c0_i32_7 = arith.constant 0 : i32
    %29 = vector.broadcast %c0_i32_7 : i32 to vector<4x64xi32>
    %30 = arith.cmpi slt, %26, %29 : vector<4x64xi32>
    %c0_i32_8 = arith.constant 0 : i32
    %31 = arith.cmpi slt, %24, %c0_i32_8 : i32
    %32 = vector.broadcast %31 : i1 to vector<4x64xi1>
    %33 = vector.broadcast %32 : vector<4x64xi1> to vector<4x64xi1>
    %34 = arith.xori %30, %33 : vector<4x64xi1>
    %35 = arith.andi %34, %28 : vector<4x64xi1>
    %36 = vector.broadcast %24 : i32 to vector<4x64xi32>
    %37 = arith.addi %26, %36 : vector<4x64xi32>
    %38 = arith.select %35, %37, %26 : vector<4x64xi1>, vector<4x64xi32>
    %39 = arith.cmpi eq, %38, %21 : vector<4x64xi32>
    %40 = arith.extui %39 : vector<4x64xi1> to vector<4x64xi32>
    %41 = arith.sitofp %40 : vector<4x64xi32> to vector<4x64xf32>
    %c0 = arith.constant 0 : index
    %c0_9 = arith.constant 0 : index
    %c0_10 = arith.constant 0 : index
    %42 = vector.load %arg1[%c0, %c0_9, %c0_10] : memref<1x16x64xbf16, #tpu.memory_space<vmem>>, vector<1x16x64xbf16>
    %43 = vector.shape_cast %42 : vector<1x16x64xbf16> to vector<16x64xbf16>
    %44 = arith.extf %43 : vector<16x64xbf16> to vector<16x64xf32>
    %cst = arith.constant 0.000000e+00 : f32
    %45 = vector.broadcast %cst : f32 to vector<16x4xf32>
    %46 = tpu.concatenate %45, %44, %45 in 1 : vector<16x4xf32>, vector<16x64xf32>, vector<16x4xf32> -> vector<16x72xf32>
    %cst_11 = arith.constant 0.000000e+00 : f32
    %47 = vector.broadcast %cst_11 : f32 to vector<1x72xf32>
    %48 = tpu.concatenate %47, %46, %47 in 0 : vector<1x72xf32>, vector<16x72xf32>, vector<1x72xf32> -> vector<18x72xf32>
    %49 = vector.extract_strided_slice %48 {offsets = [0, 0], sizes = [16, 72], strides = [1, 1]} : vector<18x72xf32> to vector<16x72xf32>
    %50 = vector.extract_strided_slice %48 {offsets = [1, 0], sizes = [16, 72], strides = [1, 1]} : vector<18x72xf32> to vector<16x72xf32>
    %51 = vector.extract_strided_slice %48 {offsets = [2, 0], sizes = [16, 72], strides = [1, 1]} : vector<18x72xf32> to vector<16x72xf32>
    %52 = tpu.concatenate %49, %50, %51 in 1 : vector<16x72xf32>, vector<16x72xf32>, vector<16x72xf32> -> vector<16x216xf32>
    %53 = arith.truncf %52 : vector<16x216xf32> to vector<16x216xbf16>
    %c0_12 = arith.constant 0 : index
    %c0_13 = arith.constant 0 : index
    %54 = vector.load %arg2[%c0_12, %c0_13] : memref<216x64xbf16, #tpu.memory_space<vmem>>, vector<216x64xbf16>
    %cst_14 = arith.constant dense<0.000000e+00> : vector<16x64xf32>
    %55 = tpu.matmul %53, %54, %cst_14 {dimension_numbers = #tpu.dot_dimension_numbers<[1], [0], [0], [1], [0, 0, 1, 1], [], []>} : vector<16x216xbf16>, vector<216x64xbf16>, vector<16x64xf32> -> vector<16x64xf32>
    %cst_15 = arith.constant dense<0.000000e+00> : vector<64xf32>
    %56 = vector.multi_reduction <add>, %55, %cst_15 [0] : vector<16x64xf32> to vector<64xf32>
    %57 = vector.shape_cast %56 : vector<64xf32> to vector<1x64xf32>
    %58 = arith.mulf %55, %55 : vector<16x64xf32>
    %cst_16 = arith.constant dense<0.000000e+00> : vector<64xf32>
    %59 = vector.multi_reduction <add>, %58, %cst_16 [0] : vector<16x64xf32> to vector<64xf32>
    %60 = vector.shape_cast %59 : vector<64xf32> to vector<1x64xf32>
    %cst_17 = arith.constant dense<0.000000e+00> : vector<1x4xf32>
    %61 = tpu.matmul %57, %20, %cst_17 {dimension_numbers = #tpu.dot_dimension_numbers<[1], [0], [0], [1], [0, 0, 1, 1], [], []>} : vector<1x64xf32>, vector<64x4xf32>, vector<1x4xf32> -> vector<1x4xf32>
    %cst_18 = arith.constant 3.906250e-03 : f32
    %62 = vector.broadcast %cst_18 : f32 to vector<1x4xf32>
    %63 = arith.mulf %61, %62 : vector<1x4xf32>
    %cst_19 = arith.constant dense<0.000000e+00> : vector<1x4xf32>
    %64 = tpu.matmul %60, %20, %cst_19 {dimension_numbers = #tpu.dot_dimension_numbers<[1], [0], [0], [1], [0, 0, 1, 1], [], []>} : vector<1x64xf32>, vector<64x4xf32>, vector<1x4xf32> -> vector<1x4xf32>
    %cst_20 = arith.constant 3.906250e-03 : f32
    %65 = vector.broadcast %cst_20 : f32 to vector<1x4xf32>
    %66 = arith.mulf %64, %65 : vector<1x4xf32>
    %67 = arith.mulf %63, %63 : vector<1x4xf32>
    %68 = arith.subf %66, %67 : vector<1x4xf32>
    %cst_21 = arith.constant 0.000000e+00 : f32
    %69 = vector.broadcast %cst_21 : f32 to vector<1x4xf32>
    %70 = arith.maximumf %68, %69 : vector<1x4xf32>
    %cst_22 = arith.constant 9.99999974E-6 : f32
    %71 = vector.broadcast %cst_22 : f32 to vector<1x4xf32>
    %72 = arith.addf %70, %71 : vector<1x4xf32>
    %73 = math.rsqrt %72 : vector<1x4xf32>
    %cst_23 = arith.constant dense<0.000000e+00> : vector<1x64xf32>
    %74 = tpu.matmul %63, %41, %cst_23 {dimension_numbers = #tpu.dot_dimension_numbers<[1], [0], [0], [1], [0, 0, 1, 1], [], []>} : vector<1x4xf32>, vector<4x64xf32>, vector<1x64xf32> -> vector<1x64xf32>
    %cst_24 = arith.constant dense<0.000000e+00> : vector<1x64xf32>
    %75 = tpu.matmul %73, %41, %cst_24 {dimension_numbers = #tpu.dot_dimension_numbers<[1], [0], [0], [1], [0, 0, 1, 1], [], []>} : vector<1x4xf32>, vector<4x64xf32>, vector<1x64xf32> -> vector<1x64xf32>
    %76 = vector.broadcast %74 : vector<1x64xf32> to vector<16x64xf32>
    %77 = arith.subf %55, %76 : vector<16x64xf32>
    %78 = vector.broadcast %75 : vector<1x64xf32> to vector<16x64xf32>
    %79 = arith.mulf %77, %78 : vector<16x64xf32>
    %cst_25 = arith.constant 0.000000e+00 : f32
    %80 = vector.broadcast %cst_25 : f32 to vector<16x64xf32>
    %81 = arith.maximumf %79, %80 : vector<16x64xf32>
    %cst_26 = arith.constant 0.000000e+00 : f32
    %82 = vector.broadcast %cst_26 : f32 to vector<16x4xf32>
    %83 = tpu.concatenate %82, %81, %82 in 1 : vector<16x4xf32>, vector<16x64xf32>, vector<16x4xf32> -> vector<16x72xf32>
    %cst_27 = arith.constant 0.000000e+00 : f32
    %84 = vector.broadcast %cst_27 : f32 to vector<1x72xf32>
    %85 = tpu.concatenate %84, %83, %84 in 0 : vector<1x72xf32>, vector<16x72xf32>, vector<1x72xf32> -> vector<18x72xf32>
    %86 = vector.extract_strided_slice %85 {offsets = [0, 0], sizes = [16, 72], strides = [1, 1]} : vector<18x72xf32> to vector<16x72xf32>
    %87 = vector.extract_strided_slice %85 {offsets = [1, 0], sizes = [16, 72], strides = [1, 1]} : vector<18x72xf32> to vector<16x72xf32>
    %88 = vector.extract_strided_slice %85 {offsets = [2, 0], sizes = [16, 72], strides = [1, 1]} : vector<18x72xf32> to vector<16x72xf32>
    %89 = tpu.concatenate %86, %87, %88 in 1 : vector<16x72xf32>, vector<16x72xf32>, vector<16x72xf32> -> vector<16x216xf32>
    %90 = arith.truncf %89 : vector<16x216xf32> to vector<16x216xbf16>
    %c0_28 = arith.constant 0 : index
    %c0_29 = arith.constant 0 : index
    %91 = vector.load %arg3[%c0_28, %c0_29] : memref<216x64xbf16, #tpu.memory_space<vmem>>, vector<216x64xbf16>
    %cst_30 = arith.constant dense<0.000000e+00> : vector<16x64xf32>
    %92 = tpu.matmul %90, %91, %cst_30 {dimension_numbers = #tpu.dot_dimension_numbers<[1], [0], [0], [1], [0, 0, 1, 1], [], []>} : vector<16x216xbf16>, vector<216x64xbf16>, vector<16x64xf32> -> vector<16x64xf32>
    %cst_31 = arith.constant dense<0.000000e+00> : vector<64xf32>
    %93 = vector.multi_reduction <add>, %92, %cst_31 [0] : vector<16x64xf32> to vector<64xf32>
    %94 = vector.shape_cast %93 : vector<64xf32> to vector<1x64xf32>
    %95 = arith.mulf %92, %92 : vector<16x64xf32>
    %cst_32 = arith.constant dense<0.000000e+00> : vector<64xf32>
    %96 = vector.multi_reduction <add>, %95, %cst_32 [0] : vector<16x64xf32> to vector<64xf32>
    %97 = vector.shape_cast %96 : vector<64xf32> to vector<1x64xf32>
    %cst_33 = arith.constant dense<0.000000e+00> : vector<1x4xf32>
    %98 = tpu.matmul %94, %20, %cst_33 {dimension_numbers = #tpu.dot_dimension_numbers<[1], [0], [0], [1], [0, 0, 1, 1], [], []>} : vector<1x64xf32>, vector<64x4xf32>, vector<1x4xf32> -> vector<1x4xf32>
    %cst_34 = arith.constant 3.906250e-03 : f32
    %99 = vector.broadcast %cst_34 : f32 to vector<1x4xf32>
    %100 = arith.mulf %98, %99 : vector<1x4xf32>
    %cst_35 = arith.constant dense<0.000000e+00> : vector<1x4xf32>
    %101 = tpu.matmul %97, %20, %cst_35 {dimension_numbers = #tpu.dot_dimension_numbers<[1], [0], [0], [1], [0, 0, 1, 1], [], []>} : vector<1x64xf32>, vector<64x4xf32>, vector<1x4xf32> -> vector<1x4xf32>
    %cst_36 = arith.constant 3.906250e-03 : f32
    %102 = vector.broadcast %cst_36 : f32 to vector<1x4xf32>
    %103 = arith.mulf %101, %102 : vector<1x4xf32>
    %104 = arith.mulf %100, %100 : vector<1x4xf32>
    %105 = arith.subf %103, %104 : vector<1x4xf32>
    %cst_37 = arith.constant 0.000000e+00 : f32
    %106 = vector.broadcast %cst_37 : f32 to vector<1x4xf32>
    %107 = arith.maximumf %105, %106 : vector<1x4xf32>
    %cst_38 = arith.constant 9.99999974E-6 : f32
    %108 = vector.broadcast %cst_38 : f32 to vector<1x4xf32>
    %109 = arith.addf %107, %108 : vector<1x4xf32>
    %110 = math.rsqrt %109 : vector<1x4xf32>
    %cst_39 = arith.constant dense<0.000000e+00> : vector<1x64xf32>
    %111 = tpu.matmul %100, %41, %cst_39 {dimension_numbers = #tpu.dot_dimension_numbers<[1], [0], [0], [1], [0, 0, 1, 1], [], []>} : vector<1x4xf32>, vector<4x64xf32>, vector<1x64xf32> -> vector<1x64xf32>
    %cst_40 = arith.constant dense<0.000000e+00> : vector<1x64xf32>
    %112 = tpu.matmul %110, %41, %cst_40 {dimension_numbers = #tpu.dot_dimension_numbers<[1], [0], [0], [1], [0, 0, 1, 1], [], []>} : vector<1x4xf32>, vector<4x64xf32>, vector<1x64xf32> -> vector<1x64xf32>
    %113 = vector.broadcast %111 : vector<1x64xf32> to vector<16x64xf32>
    %114 = arith.subf %92, %113 : vector<16x64xf32>
    %115 = vector.broadcast %112 : vector<1x64xf32> to vector<16x64xf32>
    %116 = arith.mulf %114, %115 : vector<16x64xf32>
    %117 = arith.addf %116, %44 : vector<16x64xf32>
    %cst_41 = arith.constant 0.000000e+00 : f32
    %118 = vector.broadcast %cst_41 : f32 to vector<16x64xf32>
    %119 = arith.maximumf %117, %118 : vector<16x64xf32>
    %c0_42 = arith.constant 0 : index
    %c0_43 = arith.constant 0 : index
    %c0_44 = arith.constant 0 : index
    %120 = vector.load %arg4[%c0_42, %c0_43, %c0_44] : memref<1x16x64xf32, #tpu.memory_space<vmem>>, vector<1x16x64xf32>
    %121 = vector.shape_cast %120 : vector<1x16x64xf32> to vector<16x64xf32>
    %122 = vector.shape_cast %119 : vector<16x64xf32> to vector<1x16x64xf32>
    tpu.vector_store %arg4[%c0_42, %c0_43, %c0_44], %122 {strides = array<i32>} : memref<1x16x64xf32, #tpu.memory_space<vmem>>, vector<1x16x64xf32>,
    return
  }
  func.func @transform_0(%arg0: i32) -> (i32, i32, i32) {
    %c0_i32 = arith.constant 0 : i32
    %c0_i32_0 = arith.constant 0 : i32
    %c0_i32_1 = arith.constant 0 : i32
    return %arg0, %c0_i32, %c0_i32_0 : i32, i32, i32
  }
  func.func @transform_1(%arg0: i32) -> (i32, i32) {
    %c0_i32 = arith.constant 0 : i32
    %c0_i32_0 = arith.constant 0 : i32
    %c0_i32_1 = arith.constant 0 : i32
    return %c0_i32, %c0_i32_0 : i32, i32
  }
  func.func @transform_2(%arg0: i32) -> (i32, i32) {
    %c0_i32 = arith.constant 0 : i32
    %c0_i32_0 = arith.constant 0 : i32
    %c0_i32_1 = arith.constant 0 : i32
    return %c0_i32, %c0_i32_0 : i32, i32
  }
  func.func @transform_3(%arg0: i32) -> (i32, i32, i32) {
    %c0_i32 = arith.constant 0 : i32
    %c0_i32_0 = arith.constant 0 : i32
    %c0_i32_1 = arith.constant 0 : i32
    return %arg0, %c0_i32, %c0_i32_0 : i32, i32, i32
  }
}

</mosaic_0001>

<bundles_post_ra>
// kernel: tpu_custom_call.1
= control target key start
LH: loop header
LB: loop body
LE: loop exit
PB: predicated region body
PF: predicated region fallthrough
CT: control target
= control target key end

     0   :  { %8 = vsyncpa [#allocation3], 0  ;;  %s2437_s0 = inlined_call_operand.vmem [shape: bf16[2,16,64], index: 0, kind: input, shape index: {}]   ;;  %s2438_s1 = inlined_call_operand.vmem [shape: bf16[216,64], index: 1, kind: input, shape index: {}]   ;;  %s2439_s2 = inlined_call_operand.vmem [shape: bf16[216,64], index: 2, kind: input, shape index: {}]   ;;  %s2440_s3 = inlined_call_operand.hbm [shape: f32[2,16,64], index: 3, kind: output, shape index: {}]  }
   0x1   :  { %10 = vsyncpa [#allocation3 + $0x1], 0  ;;  %s1988_s12 = smov 0   ;;  %s1990_s13 = smov 0  }
   0x2   :  { %s1992_s14 = smov 0   ;;  %s1994_s15 = smov 0  }
   0x3 LB: > { %s2009_s16 = sadd.s32 4294967295, %s1955_s15   ;;  %s1493_s17 = sadd.s32 4294967294, %s1955_s15   ;;  %s1955_s15 = sphi %s1994_s15, %s2454_s15   ;;  %s1951_s14 = sphi %s1992_s14, %s2453_s14   ;;  %s1947_s13 = sphi %s1990_s13, %s2452_s13   ;;  %s1943_s12 = sphi %s1988_s12, %s2451_s12  }
   0x4   : > { %s2013_s18 = sadd.s32 1, %s1955_s15   ;;  %s91_s19 = sadd.s32 1, %s1951_s14 }
   0x5   : > { %s88_s20 = ssub.s32 %s1955_s15, %s2013_s18  ;;  %p101_p0 = scmp.ne.s32.totalorder %s1951_s14, %s1947_s13 }
   0x6   : > { %p89_p1 = scmp.eq.s32.totalorder %s88_s20, 0  ;;  %p102_p2 = scmp.eq.s32.totalorder %s2009_s16, 1 }
   0x7   : > { %p107_p3 = scmp.ne.s32.totalorder %s1947_s13, %s1943_s12  ;;  %p108_p4 = scmp.eq.s32.totalorder %s1493_s17, 1 }
   0x8   : > { %s2024_s21 = scalar_select %p89_p1, %s1951_s14, %s91_s19  }
   0x9   : > { %p2026_p5 = por %p102_p2, %p101_p0  ;;  %p2030_p6 = por %p108_p4, %p107_p3 }
   0xa   : > { %p1496_p7 = scmp.ge.s32.totalorder %s1955_s15, 1  ;;  %p140_p8 = scmp.lt.s32.totalorder %s1955_s15, 3 }
   0xc   : > { %p141_p9 = pnand %p1496_p7, %p140_p8 }
   0xd   : > { %p164_p10 = scmp.lt.s32.totalorder (!%p141_p9), %s2009_s16, 1  ;;  %s1957_s29 = smov (!%p141_p9), 4   ;;  %v1861_v4 = vld [vmem:[%s2438_s1] sm:$0xff] (!%p141_p9)   ;;  %v1958_v5 = vmov (!%p141_p9), 0   ;;  %v1862_v6 = vld [vmem:[%s2438_s1 + $0x8] sm:$0xff] (!%p141_p9)   ;;  %v1863_v7 = vld [vmem:[%s2438_s1 + $0x10] sm:$0xff] (!%p141_p9)   ;;  %v170_v56 = vlaneseq (!%p141_p9) }
   0xe   : > { %144 = sbr.rel (%p141_p9) target bundleno = 1935 (0x78f), region = 32  ;;  %495 = vmatprep.subr.bf16.mxu0 (!%p141_p9), %v1958_v5  ;;  %v1864_v8 = vld [vmem:[%s2438_s1 + $0x18] sm:$0xff] (!%p141_p9)   ;;  %v1865_v9 = vld [vmem:[%s2438_s1 + $0x20] sm:$0xff] (!%p141_p9)   ;;  %v1866_v10 = vld [vmem:[%s2438_s1 + $0x28] sm:$0xff] (!%p141_p9)   ;;  %vm328_vm0 = vcmask (!%p141_p9), 31744   ;;  %vm331_vm1 = vcmask (!%p141_p9), 556032  }
   0xf   : > { %496 = vmatpush1.bf16.msra.mxu0 (!%p141_p9), %v1861_v4  ;;  %v1867_v11 = vld [vmem:[%s2438_s1 + $0x30] sm:$0xff] (!%p141_p9)   ;;  %v1868_v12 = vld [vmem:[%s2438_s1 + $0x38] sm:$0xff] (!%p141_p9)   ;;  %v1869_v13 = vld [vmem:[%s2438_s1 + $0x40] sm:$0xff] (!%p141_p9)   ;;  %vm491_vm2 = vcmask (!%p141_p9), 1043456   ;;  %vm336_vm3 = vcmask (!%p141_p9), 1040384   ;;  %vm359_vm4 = vcmask (!%p141_p9), 1045504  }
  0x10   : > { %497 = vmatprep.subr.bf16.mxu0 (!%p141_p9), %v1958_v5  ;;  %v1870_v14 = vld [vmem:[%s2438_s1 + $0x48] sm:$0xff] (!%p141_p9)   ;;  %v1871_v15 = vld [vmem:[%s2438_s1 + $0x50] sm:$0xff] (!%p141_p9)   ;;  %v1872_v16 = vld [vmem:[%s2438_s1 + $0x58] sm:$0xff] (!%p141_p9)   ;;  %vm347_vm5 = vcmask (!%p141_p9), 1046528   ;;  %s1959_s20 = smov (!%p141_p9), 16   ;;  %vm374_vm6 = vcmask (!%p141_p9), 130048  }
  0x11   : > { %v1873_v17 = vld [vmem:[%s2438_s1 + $0x60] sm:$0xff] (!%p141_p9)   ;;  %v1874_v21 = vld [vmem:[%s2438_s1 + $0x68] ss:$0 sps:$4 sm:$0xff] (!%p141_p9)   ;;  %vm371_vm7 = vcmask (!%p141_p9), 588800   ;;  %vm487_vm8 = vcmask (!%p141_p9), 719872   ;;  %v2125_v57 = vshrl.u32 (!%p141_p9), %v170_v56, 7 }
  0x12   : > { %v493_v24 = vsel (!%p141_p9), %vm491_vm2, %v1874_v21, 0  ;;  %v2128_v59 = vand.u32 (!%p141_p9), 127, %v170_v56  ;;  %v1961_v62 = vmov (!%p141_p9), 0.0|0.0   ;;  %s1589_s10 = sshll.u32 (!%p141_p9), %s2009_s16, 8 }
  0x13   : > { %498 = vmatpush1.bf16.msra.mxu0 (!%p141_p9), %v1862_v6  ;;  %v172_v58 = vadd.s32 (!%p141_p9), 8, %v2125_v57  ;;  %v185_v60 = vand.u32 (!%p141_p9), 3, %v2125_v57  ;;  %1734 = vmatprep.subr.bf16.mxu1 (!%p141_p9), %v1961_v62  ;;  %v174_v4 = vadd.s32 (!%p141_p9), 24, %v2125_v57  ;;  %v1962_v6 = vmov (!%p141_p9), 1.0|1.0   ;;  %s2390_s26 = scalar_lea.hbm (!%p141_p9), %s2440_s3, %s1589_s10 }
  0x14   : > { %499 = vmatprep.subr.bf16.mxu0 (!%p141_p9), %v1958_v5 }
  0x15   : > { %s165_s24 = scalar_select %p164_p10, %s2009_s16, 1  ;;  %v192_v61 = vand.u32 3, %v172_v58  ;;  %vm277_vm9 = vcmp.eq.s32.totalorder %v185_v60, %v2128_v59 }
  0x17   : > { %s1588_s25 = sshll.u32 %s165_s24, 3  ;;  %500 = vmatpush1.bf16.msra.mxu0 %v1863_v7  ;;  %s1960_s24 = smov 72   ;;  %vm278_vm10 = vcmp.eq.s32.totalorder %v192_v61, %v2128_v59 }
  0x18   : > { %s168_s28 = scalar_lea.vmem %s2437_s0, %s1588_s25  ;;  %501 = vmatprep.subr.bf16.mxu0 %v1958_v5  ;;  %vm2134_vm11 = vmpackc.low %vm278_vm10, %vm277_vm9 }
  0x19   : > { %v2041_v0 = vld [vmem:[%s168_s28] sm:$0xff]   ;;  %1736 = vmatpush3.bf16.msk.msra.mxu1 %vm2134_vm11, %v1962_v6  ;;  %s1965_s28 = smov [#allocation2]  }
  0x1a   : > { %v1592_v1 = vunpack.c.l.bf16 %v2041_v0  ;;  %v1593_v2 = vunpack.c.h.bf16 %v2041_v0  ;;  %1737 = vmatprep.subr.bf16.mxu1 %v1961_v62  ;;  %s1897_s30 = sshll.u32 %s1965_s28, 4  ;;  %s1898_s30 = int_to_ptr.vmem [resolvable:$false] %s1897_s30 }
  0x1b   : > { %502 = vmatpush1.bf16.msra.mxu0 %v1864_v8  ;;  %v206_v8 = vand.u32 3, %v174_v4  ;;  %s1899_s4 = scalar_lea.vmem %s1898_s30, 512 }
  0x1c   : > { %v1831_v3 = vpack.i.bf16 %v1593_v2, %v1592_v1  ;;  %503 = vmatprep.subr.bf16.mxu0 %v1958_v5 }
  0x1d   : > { %vm280_vm13 = vcmp.eq.s32.totalorder %v206_v8, %v2128_v59 }
  0x1e   : > { %1832 = vrot.lane.b32.xlu0 %v1831_v3, %s1957_s29  ;;  %v173_v3 = vadd.s32 16, %v2125_v57 }
  0x1f   : > { %504 = vmatpush1.bf16.msra.mxu0 %v1865_v9  ;;  %v175_v9 = vadd.s32 32, %v2125_v57 }
  0x20   : > { %505 = vmatprep.subr.bf16.mxu0 %v1958_v5  ;;  %v199_v7 = vand.u32 3, %v173_v3 }
  0x22   : > { %vm279_vm12 = vcmp.eq.s32.totalorder %v199_v7, %v2128_v59 }
  0x23   : > { %506 = vmatpush1.bf16.msra.mxu0 %v1866_v10  ;;  %v176_v10 = vadd.s32 40, %v2125_v57  ;;  %vm2153_vm14 = vmpackc.low %vm280_vm13, %vm279_vm12 }
  0x24   : > { %507 = vmatprep.subr.bf16.mxu0 %v1958_v5  ;;  %1739 = vmatpush3.bf16.msk.msra.mxu1 %vm2153_vm14, %v1962_v6 }
  0x25   : > { %1740 = vmatprep.subr.bf16.mxu1 %v1961_v62 }
  0x27   : > { %508 = vmatpush1.bf16.msra.mxu0 %v1867_v11 }
  0x28   : > { %509 = vmatprep.subr.bf16.mxu0 %v1958_v5 }
  0x2b   : > { %510 = vmatpush1.bf16.msra.mxu0 %v1868_v12  ;;  %v213_v12 = vand.u32 3, %v175_v9 }
  0x2c   : > { %511 = vmatprep.subr.bf16.mxu0 %v1958_v5 }
  0x2d   : > { %vm281_vm15 = vcmp.eq.s32.totalorder %v213_v12, %v2128_v59 }
  0x2f   : > { %512 = vmatpush1.bf16.msra.mxu0 %v1869_v13  ;;  %v220_v13 = vand.u32 3, %v176_v10 }
  0x30   : > { %513 = vmatprep.subr.bf16.mxu0 %v1958_v5 }
  0x31   : > { %vm282_vm9 = vcmp.eq.s32.totalorder %v220_v13, %v2128_v59 }
  0x32   : > { %vm2169_vm10 = vmpackc.low %vm282_vm9, %vm281_vm15  ;;  %vm1963_vm9 = vmmov 0  }
  0x33   : > { %514 = vmatpush1.bf16.msra.mxu0 %v1870_v14  ;;  %v177_v14 = vadd.s32 48, %v2125_v57  ;;  %1742 = vmatpush3.bf16.msk.msra.mxu1 %vm2169_vm10, %v1962_v6 }
  0x34   : > { %515 = vmatprep.subr.bf16.mxu0 %v1958_v5  ;;  %1743 = vmatprep.subr.bf16.mxu1 %v1961_v62 }
  0x37   : > { %516 = vmatpush1.bf16.msra.mxu0 %v1871_v15  ;;  %v178_v15 = vadd.s32 56, %v2125_v57 }
  0x38   : > { %517 = vmatprep.subr.bf16.mxu0 %v1958_v5 }
  0x3b   : > { %518 = vmatpush1.bf16.msra.mxu0 %v1872_v16 }
  0x3c   : > { %519 = vmatprep.subr.bf16.mxu0 %v1958_v5 }
  0x3f   : > { %520 = vmatpush1.bf16.msra.mxu0 %v1873_v17  ;;  %v227_v17 = vand.u32 3, %v177_v14 }
  0x40   : > { %521 = vmatprep.subr.bf16.mxu0 %v1958_v5 }
  0x41   : > { %vm283_vm12 = vcmp.eq.s32.totalorder %v227_v17, %v2128_v59 }
  0x43   : > { %522 = vmatpush1.bf16.msra.mxu0 %v493_v24 }
  0x44   : > { %1758 = vmatprep.subr.bf16.mxu0 %v1961_v62 }
  0x90   : > { %v1833_v18 = vpop.permute.xlu0 %1832 }
  0x91   : > { %v1835_v19 = vunpack.i.h.bf16 %v1833_v18  ;;  %v1834_v20 = vunpack.i.l.bf16 %v1833_v18  ;;  %v234_v18 = vand.u32 3, %v178_v15 }
  0x93   : > { %v330_v22 = vsel %vm328_vm0, 0.0, %v1835_v19  ;;  %v329_v23 = vsel %vm328_vm0, 0.0, %v1834_v20  ;;  %vm284_vm13 = vcmp.eq.s32.totalorder %v234_v18, %v2128_v59  ;;  %v1964_v20 = vmov 0.0   ;;  %v1876_v18 = vld [vmem:[%s2439_s2 + $0x8] sm:$0xff]  }
  0x94   : > { %v333_v25 = vsel %vm331_vm1, %v330_v22, 0.0  ;;  %v332_v26 = vsel %vm331_vm1, %v329_v23, 0.0  ;;  %vm2183_vm15 = vmpackc.low %vm284_vm13, %vm283_vm12  ;;  %1654 = vmatprep.mubr.msk.f32.mxu1 %vm1963_vm9, %v1964_v20  ;;  %vm536_vm12 = vcmask 523264  }
  0x95   : > { %v338_v27 = vrot.slane %v333_v25, 7  ;;  %v337_v28 = vrot.slane %v332_v26, 7  ;;  %1745 = vmatpush3.bf16.msk.msra.mxu1 %vm2183_vm15, %v1962_v6 }
  0x96   : > { %1746 = vmatprep.subr.bf16.mxu1 %v1961_v62 }
  0x97   : > { %v344_v29 = vsel %vm336_vm3, %v338_v27, 0.0  ;;  %v343_v30 = vsel %vm336_vm3, 0.0, %v337_v28  ;;  %v339_v31 = vsel %vm336_vm3, %v337_v28, %v338_v27 }
  0x98   : > { %v351_v32 = vrot.slane %v344_v29, 1  ;;  %v348_v33 = vrot.slane %v343_v30, 1  ;;  %v360_v34 = vrot.slane %v343_v30, 2  ;;  %v361_v35 = vrot.slane %v339_v31, 2 }
  0x99   : > { %v363_v36 = vrot.slane %v344_v29, 2  ;;  %v349_v37 = vrot.slane %v339_v31, 1 }
  0x9a   : > { %v362_v38 = vsel %vm359_vm4, %v360_v34, %v361_v35 }
  0x9b   : > { %v364_v39 = vsel %vm359_vm4, %v361_v35, %v363_v36  ;;  %v350_v40 = vsel %vm347_vm5, %v348_v33, %v349_v37  ;;  %v352_v41 = vsel %vm347_vm5, %v349_v37, %v351_v32 }
  0x9c   : > { %v1841_v42 = vpack.i.bf16 %v364_v39, %v362_v38  ;;  %v1836_v43 = vpack.i.bf16 %v352_v41, %v350_v40 }
  0x9e   : > { %1842 = vrot.lane.b32.xlu1 %v1841_v42, %s1959_s20  ;;  %1837 = vrot.lane.b32.xlu0 %v1836_v43, %s1960_s24 }
 0x110   : > { %v1843_v44 = vpop.permute.xlu1 %1842  ;;  %v1838_v45 = vpop.permute.xlu0 %1837 }
 0x111   : > { %v1845_v46 = vunpack.i.h.bf16 %v1843_v44  ;;  %v1844_v47 = vunpack.i.l.bf16 %v1843_v44  ;;  %v1840_v48 = vunpack.i.h.bf16 %v1838_v45  ;;  %v1839_v49 = vunpack.i.l.bf16 %v1838_v45 }
 0x112   : > { %v305_v45 = vand.u32 3, %v2128_v59  ;;  %v2251_v59 = vsub.s32 0, %v2125_v57 }
 0x113   : > { %v375_v50 = vsel %vm374_vm6, %v1839_v49, %v1844_v47  ;;  %v376_v51 = vsel %vm374_vm6, %v1840_v48, %v1845_v46  ;;  %v372_v52 = vsel %vm371_vm7, %v343_v30, %v1839_v49  ;;  %v373_v53 = vsel %vm371_vm7, %v339_v31, %v1840_v48 }
 0x114   : > { %v378_v54 = vpack.c.bf16 %v376_v51, %v375_v50  ;;  %v377_v55 = vpack.c.bf16 %v373_v53, %v372_v52  ;;  %vm313_vm13 = vcmp.eq.s32.totalorder %v305_v45, %v2125_v57  ;;  %v1875_v57 = vld [vmem:[%s2439_s2] sm:$0xff]  }
 0x115   : > { %v2238_v46 = vsel %vm313_vm13, 1.0, %v1964_v20 }
 0x116   : > { %1523 = vmatprep.mubr.msk.bf16.mxu0 %vm487_vm8, %v378_v54 }
 0x117   : > { %528 = vmatmul.mubr.bf16.vlgmr.msra.gmra.mrb[0].mxu0 %v377_v55 }
 0x118   : > { %1760 = vmatpush3.bf16.msk.msra.mxu0 %vm2134_vm11, %v1962_v6  ;;  %1702 = vmatprep.mubr.msk.f32.mxu0 %vm1963_vm9, %v1964_v20 }
 0x119   : > { %1761 = vmatprep.subr.bf16.mxu0 %v1961_v62 }
 0x11c   : > { %1763 = vmatpush3.bf16.msk.msra.mxu0 %vm2153_vm14, %v1962_v6 }
 0x11d   : > { %1764 = vmatprep.subr.bf16.mxu0 %v1961_v62 }
 0x120   : > { %1766 = vmatpush3.bf16.msk.msra.mxu0 %vm2169_vm10, %v1962_v6 }
 0x121   : > { %1767 = vmatprep.subr.bf16.mxu0 %v1961_v62 }
 0x124   : > { %1769 = vmatpush3.bf16.msk.msra.mxu0 %vm2183_vm15, %v1962_v6 }
 0x125   : > { %1770 = vmatprep.subr.bf16.mxu0 %v1961_v62 }
 0x1ea   : > { %v2199_v21 = vpop.f32.mrb[0].mxu0 }
 0x1eb   : > { %v546_v22 = vmul.f32 %v2199_v21, %v2199_v21  ;;  %v531_v23 = vpop.f32.mrb[1].mxu0  ;;  %v537_v25 = vsel %vm536_vm12, %v2199_v21, 0.0 }
 0x1ec   : > { %v2203_v24 = vpop.f32.mrb[2].mxu0  ;;  %v1879_v23 = vld [vmem:[%s2439_s2 + $0x20] sm:$0xff]  }
 0x1ed   : > { %v538_v26 = vsel %vm536_vm12, %v2203_v24, 0.0  ;;  %v547_v27 = vmul.f32 %v2203_v24, %v2203_v24  ;;  %v534_v28 = vpop.f32.mrb[3].mxu0  ;;  %v548_v30 = vsel %vm536_vm12, %v546_v22, 0.0  ;;  %v1878_v22 = vld [vmem:[%s2439_s2 + $0x18] sm:$0xff]  }
 0x1ee   : > { %v539_v29 = vadd.f32 %v538_v26, %v537_v25  ;;  %v1881_v25 = vld [vmem:[%s2439_s2 + $0x30] sm:$0xff]   ;;  %v1882_v26 = vld [vmem:[%s2439_s2 + $0x38] sm:$0xff]   ;;  %v1884_v28 = vld [vmem:[%s2439_s2 + $0x48] sm:$0xff]  }
 0x1ef   : > { %v549_v31 = vsel %vm536_vm12, %v547_v27, 0.0  ;;  %v1883_v27 = vld [vmem:[%s2439_s2 + $0x40] sm:$0xff]  }
 0x1f0   : > { %v540_v32 = vrot.slane %v539_v29, 4  ;;  %v550_v33 = vadd.f32 %v549_v31, %v548_v30  ;;  %v1886_v30 = vld [vmem:[%s2439_s2 + $0x58] sm:$0xff]   ;;  %v1887_v31 = vld [vmem:[%s2439_s2 + $0x60] sm:$0xff]  }
 0x1f2   : > { %v541_v34 = vadd.f32 %v540_v32, %v539_v29  ;;  %v551_v37 = vrot.slane %v550_v33, 4  ;;  %v1885_v29 = vld [vmem:[%s2439_s2 + $0x50] sm:$0xff]  }
 0x1f4   : > { %v542_v35 = vrot.slane %v541_v34, 2  ;;  %v552_v39 = vadd.f32 %v551_v37, %v550_v33 }
 0x1f6   : > { %v543_v36 = vadd.f32 %v542_v35, %v541_v34  ;;  %v553_v41 = vrot.slane %v552_v39, 2  ;;  %v1888_v35 = vld [vmem:[%s2439_s2 + $0x68] ss:$0 sps:$4 sm:$0xff]  }
 0x1f8   : > { %v544_v38 = vrot.slane %v543_v36, 1  ;;  %v554_v42 = vadd.f32 %v553_v41, %v552_v39 }
 0x1fa   : > { %v545_v40 = vadd.f32 %v544_v38, %v543_v36  ;;  %v555_v43 = vrot.slane %v554_v42, 1  ;;  %v1037_v38 = vsel %vm491_vm2, %v1888_v35, 0 }
 0x1fc   : > { %1655 = vmatmul.mubr.msk.f32.vlgmr.msra.gmra.mrb[0].mxu1 %vm536_vm12, %v545_v40  ;;  %v556_v44 = vadd.f32 %v555_v43, %v554_v42 }
 0x1fd   : > { %1748 = vmatpush3.bf16.msk.msra.mxu1 %vm2134_vm11, %v1962_v6  ;;  %1673 = vmatprep.mubr.msk.f32.mxu1 %vm1963_vm9, %v1964_v20 }
 0x1fe   : > { %1749 = vmatprep.subr.bf16.mxu1 %v1961_v62 }
 0x201   : > { %1751 = vmatpush3.bf16.msk.msra.mxu1 %vm2153_vm14, %v1962_v6 }
 0x202   : > { %1752 = vmatprep.subr.bf16.mxu1 %v1961_v62 }
 0x205   : > { %1754 = vmatpush3.bf16.msk.msra.mxu1 %vm2169_vm10, %v1962_v6 }
 0x206   : > { %1755 = vmatprep.subr.bf16.mxu1 %v1961_v62 }
 0x209   : > { %1757 = vmatpush3.bf16.msk.msra.mxu1 %vm2183_vm15, %v1962_v6 }
 0x20a   : > { %1676 = vmatprep.subr.mxu1 %v1964_v20 }
 0x20c   : > { %1674 = vmatmul.mubr.msk.f32.vlgmr.msra.gmra.mrb[2].mxu1 %vm536_vm12, %v556_v44 }
 0x20d   : > { %1678 = vmatprep.mubr.msk.f32.mxu1 %vm1963_vm9, %v1964_v20  ;;  %1677 = vmatpush3.msk.msra.mxu1 %vm491_vm2, %v2238_v46 }
 0x20e   : > { %1681 = vmatprep.subr.mxu1 %v1964_v20 }
 0x2cf   : > { %v626_v47 = vpop.f32.mrb[0].mxu1 }
 0x2d0   : > { %v630_v48 = vmul.f32 0.00390625, %v626_v47  ;;  %v1656_v49 = vpop.f32.mrb[1].mxu1 }
 0x2d2   : > { %1679 = vmatmul.mubr.msk.f32.vlgmr.msra.gmra.mrb[4].mxu1 %vm328_vm0, %v630_v48  ;;  %v705_v51 = vmul.f32 %v630_v48, %v630_v48 }
 0x2d3   : > { %1682 = vmatpush3.msk.msra.mxu1 %vm491_vm2, %v2238_v46  ;;  %1683 = vmatprep.mubr.msk.f32.mxu1 %vm1963_vm9, %v1964_v20 }
 0x2d4   : > { %1039 = vmatprep.subr.bf16.mxu1 %v1958_v5 }
 0x2df   : > { %v700_v50 = vpop.f32.mrb[2].mxu1 }
 0x2e0   : > { %v704_v52 = vmul.f32 0.00390625, %v700_v50  ;;  %v1675_v53 = vpop.f32.mrb[3].mxu1 }
 0x2e2   : > { %v706_v54 = vsub.f32 %v704_v52, %v705_v51 }
 0x2e4   : > { %v707_v55 = vmax.f32 %v706_v54, 0.0 }
 0x2e6   : > { %v708_v56 = vadd.f32 1e-05, %v707_v55 }
 0x2e8   : > { %1889 = vrsqrt.f32 %v708_v56 }
 0x2f2   : > { %v1890_v58 = vpop.eup %1889 }
 0x2f3   : > { %1684 = vmatmul.mubr.msk.f32.vlgmr.msra.gmra.mrb[6].mxu1 %vm328_vm0, %v1890_v58 }
 0x2f4   : > { %1040 = vmatpush1.bf16.msra.mxu1 %v1875_v57 }
 0x2f5   : > { %1041 = vmatprep.subr.bf16.mxu1 %v1958_v5 }
 0x2f8   : > { %1042 = vmatpush1.bf16.msra.mxu1 %v1876_v18 }
 0x2f9   : > { %1043 = vmatprep.subr.bf16.mxu1 %v1958_v5 }
 0x3a5   : > { %v782_v60 = vpop.f32.mrb[4].mxu1 }
 0x3a6   : > { %v862_v61 = vrot.slane %v782_v60, %v2251_v59  ;;  %v1680_v3 = vpop.f32.mrb[5].mxu1 }
 0x3a8   : > { %v863_v4 = vsub.f32 %v2199_v21, %v862_v61  ;;  %v864_v7 = vsub.f32 %v2203_v24, %v862_v61  ;;  %v1877_v21 = vld [vmem:[%s2439_s2 + $0x10] sm:$0xff]   ;;  %v1880_v24 = vld [vmem:[%s2439_s2 + $0x28] sm:$0xff]  }
 0x3a9   : > { %1044 = vmatpush1.bf16.msra.mxu1 %v1877_v21 }
 0x3aa   : > { %1045 = vmatprep.subr.bf16.mxu1 %v1958_v5 }
 0x3ad   : > { %1046 = vmatpush1.bf16.msra.mxu1 %v1878_v22 }
 0x3ae   : > { %1047 = vmatprep.subr.bf16.mxu1 %v1958_v5 }
 0x3b1   : > { %1048 = vmatpush1.bf16.msra.mxu1 %v1879_v23 }
 0x3b2   : > { %1049 = vmatprep.subr.bf16.mxu1 %v1958_v5 }
 0x3b5   : > { %1050 = vmatpush1.bf16.msra.mxu1 %v1880_v24 }
 0x3b6   : > { %1051 = vmatprep.subr.bf16.mxu1 %v1958_v5 }
 0x3b9   : > { %1052 = vmatpush1.bf16.msra.mxu1 %v1881_v25 }
 0x3ba   : > { %1053 = vmatprep.subr.bf16.mxu1 %v1958_v5 }
 0x3bd   : > { %1054 = vmatpush1.bf16.msra.mxu1 %v1882_v26 }
 0x3be   : > { %1055 = vmatprep.subr.bf16.mxu1 %v1958_v5 }
 0x3c1   : > { %1056 = vmatpush1.bf16.msra.mxu1 %v1883_v27 }
 0x3c2   : > { %1057 = vmatprep.subr.bf16.mxu1 %v1958_v5 }
 0x3c5   : > { %1058 = vmatpush1.bf16.msra.mxu1 %v1884_v28 }
 0x3c6   : > { %v855_v8 = vpop.f32.mrb[6].mxu1  ;;  %1059 = vmatprep.subr.bf16.mxu1 %v1958_v5 }
 0x3c7   : > { %v868_v9 = vrot.slane %v855_v8, %v2251_v59  ;;  %v1685_v10 = vpop.f32.mrb[7].mxu1 }
 0x3c9   : > { %v869_v12 = vmul.f32 %v868_v9, %v863_v4  ;;  %v870_v13 = vmul.f32 %v868_v9, %v864_v7  ;;  %1060 = vmatpush1.bf16.msra.mxu1 %v1885_v29 }
 0x3ca   : > { %1061 = vmatprep.subr.bf16.mxu1 %v1958_v5 }
 0x3cb   : > { %v871_v14 = vmax.f32 %v869_v12, 0.0  ;;  %v872_v15 = vmax.f32 %v870_v13, 0.0 }
 0x3cd   : > { %v1846_v17 = vpack.i.bf16 %v872_v15, %v871_v14  ;;  %1062 = vmatpush1.bf16.msra.mxu1 %v1886_v30 }
 0x3ce   : > { %1063 = vmatprep.subr.bf16.mxu1 %v1958_v5 }
 0x3cf   : > { %1847 = vrot.lane.b32.xlu1 %v1846_v17, %s1957_s29 }
 0x3d1   : > { %1064 = vmatpush1.bf16.msra.mxu1 %v1887_v31 }
 0x3d2   : > { %1065 = vmatprep.subr.bf16.mxu1 %v1958_v5 }
 0x3d5   : > { %1066 = vmatpush1.bf16.msra.mxu1 %v1037_v38 }
 0x441   : > { %v1848_v32 = vpop.permute.xlu1 %1847 }
 0x442   : > { %v1850_v33 = vunpack.i.h.bf16 %v1848_v32  ;;  %v1849_v34 = vunpack.i.l.bf16 %v1848_v32 }
 0x444   : > { %v882_v36 = vsel %vm328_vm0, 0.0, %v1850_v33  ;;  %v881_v37 = vsel %vm328_vm0, 0.0, %v1849_v34 }
 0x445   : > { %v884_v39 = vsel %vm331_vm1, %v882_v36, 0.0  ;;  %v883_v40 = vsel %vm331_vm1, %v881_v37, 0.0 }
 0x446   : > { %v888_v41 = vrot.slane %v884_v39, 7  ;;  %v887_v5 = vrot.slane %v883_v40, 7 }
 0x448   : > { %v894_v42 = vsel %vm336_vm3, %v888_v41, 0.0  ;;  %v889_v43 = vsel %vm336_vm3, %v887_v5, %v888_v41  ;;  %v893_v44 = vsel %vm336_vm3, 0.0, %v887_v5 }
 0x449   : > { %v900_v45 = vrot.slane %v894_v42, 1  ;;  %v911_v47 = vrot.slane %v894_v42, 2  ;;  %v897_v48 = vrot.slane %v893_v44, 1  ;;  %v908_v49 = vrot.slane %v893_v44, 2 }
 0x44a   : > { %v909_v50 = vrot.slane %v889_v43, 2  ;;  %v898_v51 = vrot.slane %v889_v43, 1 }
 0x44c   : > { %v910_v52 = vsel %vm359_vm4, %v908_v49, %v909_v50  ;;  %v912_v53 = vsel %vm359_vm4, %v909_v50, %v911_v47  ;;  %v899_v54 = vsel %vm347_vm5, %v897_v48, %v898_v51  ;;  %v901_v55 = vsel %vm347_vm5, %v898_v51, %v900_v45 }
 0x44d   : > { %v1856_v56 = vpack.i.bf16 %v912_v53, %v910_v52  ;;  %v1851_v58 = vpack.i.bf16 %v901_v55, %v899_v54 }
 0x44f   : > { %1857 = vrot.lane.b32.xlu1 %v1856_v56, %s1959_s20  ;;  %1852 = vrot.lane.b32.xlu0 %v1851_v58, %s1960_s24  ;;  %s161_s20 = sand.u32 1, %s1947_s13  }
 0x450   : > { %s1497_s24 = sshll.u32 %s161_s20, 4  ;;  %s2396_s16 = scalar_lea.sflag [#allocation3], %s161_s20 }
 0x451   : > { %s163_s11 = scalar_lea.vmem [#allocation2], %s1497_s24 }
 0x452   : > { %s1431_s17 = sshll.u32 %s163_s11, 4  ;;  %s2392_s17 = int_to_ptr.vmem [resolvable:$true] %s1431_s17 }
 0x453   : > { %s1893_s27 = scalar_lea.vmem %s2392_s17, 256  ;;  %p1900_p0 = scmp.lt.s32.totalorder %s2392_s17, %s1898_s30 }
 0x454   : > { %p1894_p11 = scmp.ne.s32.totalorder %s2392_s17, %s1893_s27  ;;  %p1901_p1 = scmp.lt.s32.totalorder %s1899_s4, %s1893_s27 }
 0x456   : > { %p1895_p12 = pnand %p1894_p11, %p2026_p5  ;;  %p1902_p2 = por %p1901_p1, %p1900_p0 }
 0x458   : > { %p1896_p13 = pneg %p1895_p12 }
 0x45a   : > { %p1903_p3 = pnand %p1902_p2, %p1896_p13 }
 0x4c1   : > { %v1858_v60 = vpop.permute.xlu1 %1857  ;;  %v1853_v61 = vpop.permute.xlu0 %1852 }
 0x4c2   : > { %v1860_v3 = vunpack.i.h.bf16 %v1858_v60  ;;  %v1859_v4 = vunpack.i.l.bf16 %v1858_v60  ;;  %v1855_v7 = vunpack.i.h.bf16 %v1853_v61  ;;  %v1854_v8 = vunpack.i.l.bf16 %v1853_v61 }
 0x4c4   : > { %v920_v9 = vsel %vm371_vm7, %v889_v43, %v1855_v7  ;;  %v922_v10 = vsel %vm374_vm6, %v1855_v7, %v1860_v3  ;;  %v919_v12 = vsel %vm371_vm7, %v893_v44, %v1854_v8  ;;  %v921_v13 = vsel %vm374_vm6, %v1854_v8, %v1859_v4 }
 0x4c5   : > { %v923_v14 = vpack.c.bf16 %v920_v9, %v919_v12  ;;  %v924_v15 = vpack.c.bf16 %v922_v10, %v921_v13 }
 0x4c7   : > { %1560 = vmatprep.mubr.msk.bf16.mxu1 %vm487_vm8, %v924_v15 }
 0x4c8   : > { %1072 = vmatmul.mubr.bf16.vlgmr.msra.gmra.mrb[8].mxu1 %v923_v14 }
 0x59b   : > { %v2332_v17 = vpop.f32.mrb[8].mxu1 }
 0x59c   : > { %v1089_v57 = vmul.f32 %v2332_v17, %v2332_v17  ;;  %v1075_v18 = vpop.f32.mrb[9].mxu1  ;;  %v1080_v22 = vsel %vm536_vm12, %v2332_v17, 0.0 }
 0x59d   : > { %v2336_v21 = vpop.f32.mrb[10].mxu1 }
 0x59e   : > { %v1081_v23 = vsel %vm536_vm12, %v2336_v21, 0.0  ;;  %v1090_v24 = vmul.f32 %v2336_v21, %v2336_v21  ;;  %v1078_v25 = vpop.f32.mrb[11].mxu1  ;;  %v1091_v27 = vsel %vm536_vm12, %v1089_v57, 0.0 }
 0x59f   : > { %v1082_v26 = vadd.f32 %v1081_v23, %v1080_v22 }
 0x5a0   : > { %v1092_v28 = vsel %vm536_vm12, %v1090_v24, 0.0 }
 0x5a1   : > { %v1083_v29 = vrot.slane %v1082_v26, 4  ;;  %v1093_v30 = vadd.f32 %v1092_v28, %v1091_v27 }
 0x5a3   : > { %v1084_v31 = vadd.f32 %v1083_v29, %v1082_v26  ;;  %v1094_v34 = vrot.slane %v1093_v30, 4 }
 0x5a5   : > { %v1085_v32 = vrot.slane %v1084_v31, 2  ;;  %v1095_v37 = vadd.f32 %v1094_v34, %v1093_v30 }
 0x5a7   : > { %v1086_v33 = vadd.f32 %v1085_v32, %v1084_v31  ;;  %v1096_v38 = vrot.slane %v1095_v37, 2 }
 0x5a9   : > { %v1087_v35 = vrot.slane %v1086_v33, 1  ;;  %v1097_v39 = vadd.f32 %v1096_v38, %v1095_v37 }
 0x5ab   : > { %v1088_v36 = vadd.f32 %v1087_v35, %v1086_v33  ;;  %v1098_v40 = vrot.slane %v1097_v39, 1 }
 0x5ad   : > { %1703 = vmatmul.mubr.msk.f32.vlgmr.msra.gmra.mrb[4].mxu0 %vm536_vm12, %v1088_v36  ;;  %v1099_v63 = vadd.f32 %v1098_v40, %v1097_v39 }
 0x5ae   : > { %1772 = vmatpush3.bf16.msk.msra.mxu0 %vm2134_vm11, %v1962_v6  ;;  %1721 = vmatprep.mubr.msk.f32.mxu0 %vm1963_vm9, %v1964_v20 }
 0x5af   : > { %1773 = vmatprep.subr.bf16.mxu0 %v1961_v62 }
 0x5b2   : > { %1775 = vmatpush3.bf16.msk.msra.mxu0 %vm2153_vm14, %v1962_v6 }
 0x5b3   : > { %1776 = vmatprep.subr.bf16.mxu0 %v1961_v62 }
 0x5b6   : > { %1778 = vmatpush3.bf16.msk.msra.mxu0 %vm2169_vm10, %v1962_v6 }
 0x5b7   : > { %1779 = vmatprep.subr.bf16.mxu0 %v1961_v62 }
 0x5ba   : > { %1781 = vmatpush3.bf16.msk.msra.mxu0 %vm2183_vm15, %v1962_v6 }
 0x5bb   : > { %1724 = vmatprep.subr.mxu0 %v1964_v20 }
 0x5bd   : > { %1722 = vmatmul.mubr.msk.f32.vlgmr.msra.gmra.mrb[6].mxu0 %vm536_vm12, %v1099_v63 }
 0x5be   : > { %1725 = vmatpush3.msk.msra.mxu0 %vm491_vm2, %v2238_v46  ;;  %1726 = vmatprep.mubr.msk.f32.mxu0 %vm1963_vm9, %v1964_v20 }
 0x5bf   : > { %1729 = vmatprep.subr.mxu0 %v1964_v20 }
 0x680   : > { %v1169_v11 = vpop.f32.mrb[4].mxu0 }
 0x681   : > { %v1173_v16 = vmul.f32 0.00390625, %v1169_v11  ;;  %v1704_v62 = vpop.f32.mrb[5].mxu0 }
 0x683   : > { %1727 = vmatmul.mubr.msk.f32.vlgmr.msra.gmra.mrb[8].mxu0 %vm328_vm0, %v1173_v16  ;;  %v1248_v19 = vmul.f32 %v1173_v16, %v1173_v16 }
 0x684   : > { %1730 = vmatpush3.msk.msra.mxu0 %vm491_vm2, %v2238_v46  ;;  %1731 = vmatprep.mubr.msk.f32.mxu0 %vm1963_vm9, %v1964_v20 }
 0x690   : > { %v1243_v6 = vpop.f32.mrb[6].mxu0 }
 0x691   : > { %v1247_v41 = vmul.f32 0.00390625, %v1243_v6  ;;  %v1723_v5 = vpop.f32.mrb[7].mxu0 }
 0x693   : > { %v1249_v42 = vsub.f32 %v1247_v41, %v1248_v19 }
 0x695   : > { %v1250_v43 = vmax.f32 %v1249_v42, 0.0 }
 0x697   : > { %v1251_v44 = vadd.f32 1e-05, %v1250_v43 }
 0x699   : > { %1891 = vrsqrt.f32 %v1251_v44 }
 0x6a3   : > { %v1892_v45 = vpop.eup %1891 }
 0x6a4   : > { %1732 = vmatmul.mubr.msk.f32.vlgmr.msra.gmra.mrb[10].mxu0 %vm328_vm0, %v1892_v45 }
 0x756   : > { %v1322_v47 = vpop.f32.mrb[8].mxu0 }
 0x757   : > { %v1402_v48 = vrot.slane %v1322_v47, %v2251_v59  ;;  %v1728_v46 = vpop.f32.mrb[9].mxu0 }
 0x759   : > { %v1403_v49 = vsub.f32 %v2332_v17, %v1402_v48  ;;  %v1404_v20 = vsub.f32 %v2336_v21, %v1402_v48 }
 0x777   : > { %v1395_v50 = vpop.f32.mrb[10].mxu0 }
 0x778   : > { %v1408_v51 = vrot.slane %v1395_v50, %v2251_v59  ;;  %v1733_v52 = vpop.f32.mrb[11].mxu0 }
 0x77a   : > { %v1409_v53 = vmul.f32 %v1408_v51, %v1403_v49  ;;  %v1410_v54 = vmul.f32 %v1408_v51, %v1404_v20 }
 0x77c   : > { %v1411_v55 = vadd.f32 %v1592_v1, %v1409_v53  ;;  %v1412_v56 = vadd.f32 %v1593_v2, %v1410_v54 }
 0x77e   : > { %v1413_v59 = vmax.f32 %v1411_v55, 0.0  ;;  %v1414_v58 = vmax.f32 %v1412_v56, 0.0 }
 0x780   : > { %1415 = vst.msk [vmem:[%s163_s11] sm:$0xff] %vm536_vm12, %v1413_v59  ;;  %1416 = vst.msk [vmem:[%s163_s11 + $0x8] sm:$0xff] %vm536_vm12, %v1414_v58 }
 0x781   : > { %1906 = shalt.err (!%p1903_p3)
}
 0x782   : > { %s1907_s29 = scalar_lea.hbm %s2390_s26, 256  ;;  %s1911_s7 = scalar_lea.hbm %s2440_s3, 512 }
 0x783   : > { %p1908_p4 = scmp.ne.s32.totalorder %s2390_s26, %s1907_s29  ;;  %p1912_p9 = scmp.lt.u32.totalorder %s2390_s26, %s2440_s3 }
 0x784   : > { %p1913_p10 = scmp.lt.u32.totalorder %s1911_s7, %s1907_s29  ;;  %p1915_p12 = scmp.lt.u32.totalorder %s1907_s29, %s2390_s26 }
 0x785   : > { %p1909_p7 = pnand %p1908_p4, %p2026_p5 }
 0x786   : > { %p1914_p11 = por %p1913_p10, %p1912_p9 }
 0x787   : > { %p1910_p8 = pneg %p1909_p7 }
 0x788   : > { %p1916_p13 = por %p1915_p12, %p1914_p11 }
 0x78a   : > { %p1917_p0 = pnand %p1916_p13, %p1910_p8 }
 0x78c   : > { %1920 = shalt.err (!%p1917_p0)
}
 0x78d   : > { %s1966_s20 = smov 128   ;;  %s1967_s24 = smov 8  }
 0x78e   : > { %1782 = dma.vmem_to_hbm [thread:$0]  (%p2026_p5), %s2392_s17, 256, %s2390_s26, %s2396_s16, %s1966_s20, %s1966_s20, %s1967_s24  }
 0x78f PF: > { %p1788_p1 = scmp.ge.s32.totalorder %s1955_s15, 2  ;;  %s1446_s10 = sand.u32 1, %s1943_s12  }
 0x790   : > { %s1447_s11 = scalar_lea.sflag [#allocation3], %s1446_s10 }
 0x791   : > { %p1785_p2 = pnand %p1788_p1, %p2030_p6 }
 0x793   : > { %1938 = dma.done.wait (!%p1785_p2), %s1447_s11, 256  }
 0x794   : > { %1940 = vsyncadd (!%p1785_p2), %s1447_s11, 4294967040  ;;  %p13_p3 = scmp.ge.s32.totalorder %s2013_s18, 4   ;;  %s2451_s12 = smov %s1947_s13 }
 0x795   : > { %s2452_s13 = smov %s1951_s14  ;;  %s2453_s14 = smov %s2024_s21 }
 0x796   : > { %s2454_s15 = smov %s2013_s18  ;;  %15 = sbr.rel (!%p13_p3) target bundleno = 3 (0x3), region = 67 }
 0x79d   :  { %1452 = vsyncpa [#allocation3], 1 }
 0x79e   :  { %1454 = vsyncpa [#allocation3 + $0x1], 1 }

</bundles_post_ra>
